<compile_context>
chip_gen: v6e
topology: v6e:2x2x1
jax: 0.10.0
libtpu: 0.0.40
codegen_flags: <defaults>
</compile_context>

<pallas_src>
import functools

import jax
import jax.numpy as jnp
import numpy as np
from jax.experimental import pallas as pl
from jax.experimental.pallas import tpu as pltpu


# ---------------------------------------------------------------------------
# Kernel 1: tiled linear  y = x @ W^T + b   (used for the fused QKV projection)
# ---------------------------------------------------------------------------

def _linear_kernel(x_ref, w_ref, b_ref, o_ref, *, compute_dtype):
    x = x_ref[...].astype(compute_dtype)           # (TM, Din)
    w = w_ref[...].astype(compute_dtype)           # (Dout, Din)  torch layout
    y = jax.lax.dot_general(
        x, w, (((1,), (1,)), ((), ())), preferred_element_type=jnp.float32
    )                                              # (TM, Dout) f32 accumulate
    o_ref[...] = (y + b_ref[...]).astype(o_ref.dtype)


def _tiled_linear(x2d, w, b, *, out_dtype, compute_dtype, tm=512):
    """Row-tiled linear. Weight block stays resident (same block index every step)."""
    n, din = x2d.shape
    dout = w.shape[0]
    tm = n if n <= tm else tm                      # whole array if it is small
    grid = (pl.cdiv(n, tm),)
    # NOTE(v7x): with 64 MiB VMEM keep tm*din + dout*din (x2 double-buffer)
    # well under the scoped limit; tm=512 is safe for beliefppg-sized E.
    return pl.pallas_call(
        functools.partial(_linear_kernel, compute_dtype=compute_dtype),
        out_shape=jax.ShapeDtypeStruct((n, dout), out_dtype),
        grid=grid,
        in_specs=[
            pl.BlockSpec((tm, din), lambda i: (i, 0)),
            pl.BlockSpec((dout, din), lambda i: (0, 0)),
            pl.BlockSpec((1, dout), lambda i: (0, 0)),
        ],
        out_specs=pl.BlockSpec((tm, dout), lambda i: (i, 0)),
        compiler_params=pltpu.CompilerParams(dimension_semantics=("parallel",)),
    )(x2d, w, b.reshape(1, dout))


# ---------------------------------------------------------------------------
# Kernel 2: per-batch-tile attention + fused output projection
# ---------------------------------------------------------------------------

def _attn_outproj_kernel(qkv_ref, wo_ref, bo_ref, o_ref, *,
                         num_heads, scaling, compute_dtype):
    G, L, three_e = qkv_ref.shape
    E = three_e // 3
    D = E // num_heads
    approx = compute_dtype == jnp.bfloat16

    qkv = qkv_ref[...]                              # (G, L, 3E)
    wo = wo_ref[...].astype(compute_dtype)          # (E, E) torch layout (out, in)
    bo = bo_ref[...]                                # (1, E) f32

    merged = []                                     # G tiles of (L, E) f32
    for g in range(G):
        q = qkv[g, :, 0 * E:1 * E]                  # (L, E)
        k = qkv[g, :, 1 * E:2 * E]
        v = qkv[g, :, 2 * E:3 * E]
        heads = []
        for h in range(num_heads):
            sl = slice(h * D, (h + 1) * D)
            qh = q[:, sl].astype(compute_dtype)     # (L, D)
            kh = k[:, sl].astype(compute_dtype)
            vh = v[:, sl].astype(compute_dtype)
            # scores = (q @ k^T) * scaling   (== (q*scaling) @ k^T, as in torch)
            s = jax.lax.dot_general(
                qh, kh, (((1,), (1,)), ((), ())),
                preferred_element_type=jnp.float32) * scaling          # (L, L) f32
            m = jnp.max(s, axis=-1, keepdims=True)
            p = jnp.exp(s - m)
            denom = jnp.sum(p, axis=-1, keepdims=True)                 # (L, 1) f32
            ctx = jnp.dot(p.astype(compute_dtype), vh,
                          preferred_element_type=jnp.float32)          # (L, D) f32
            # deferred normalization: scale the (L, D) context, not (L, L) probs
            heads.append(ctx * pl.reciprocal(denom, approx=approx))
        merged.append(jnp.concatenate(heads, axis=-1))                 # (L, E)

    attn = jnp.concatenate(merged, axis=0)          # (G*L, E) f32, batch-major rows
    proj = jax.lax.dot_general(
        attn.astype(compute_dtype), wo, (((1,), (1,)), ((), ())),
        preferred_element_type=jnp.float32) + bo    # (G*L, E)
    o_ref[...] = proj.reshape(G, L, E).astype(o_ref.dtype)


def _attention_core(qkv, wo, bo, *, num_heads, scaling, compute_dtype, g_block=8):
    B, L, three_e = qkv.shape
    E = three_e // 3
    G = B if B <= g_block else g_block
    grid = (pl.cdiv(B, G),)
    return pl.pallas_call(
        functools.partial(_attn_outproj_kernel, num_heads=num_heads,
                          scaling=scaling, compute_dtype=compute_dtype),
        out_shape=jax.ShapeDtypeStruct((B, L, E), jnp.float32),
        grid=grid,
        in_specs=[
            pl.BlockSpec((G, L, three_e), lambda i: (i, 0, 0)),
            pl.BlockSpec((E, E), lambda i: (0, 0)),
            pl.BlockSpec((1, E), lambda i: (0, 0)),
        ],
        out_specs=pl.BlockSpec((G, L, E), lambda i: (i, 0, 0)),
        compiler_params=pltpu.CompilerParams(dimension_semantics=("parallel",)),
    )(qkv, wo, bo.reshape(1, E))


# ---------------------------------------------------------------------------
# Module wrapper
# ---------------------------------------------------------------------------

def multihead_attention_pallas(query, key, value, params, num_heads, *,
                               compute_dtype=jnp.float32):
    """query/key/value: (B, L, E) float32, batch_first layout."""
    B, Lq, E = query.shape
    Lk = key.shape[1]
    assert Lk == Lq, "module asserts src_len == tgt_len"
    H = num_heads
    D = E // H
    scaling = float(D) ** (-0.5)
    cd = compute_dtype

    if (query is key) and (key is value):
        # Self-attention: one fused (3E, E) projection, input read from HBM once.
        wqkv = jnp.concatenate(
            [params["wq"], params["wk"], params["wv"]], axis=0).astype(cd)
        bqkv = jnp.concatenate([params["bq"], params["bk"], params["bv"]], axis=0)
        qkv = _tiled_linear(query.reshape(B * Lq, E).astype(cd), wqkv, bqkv,
                            out_dtype=cd, compute_dtype=cd)
        qkv = qkv.reshape(B, Lq, 3 * E)
    else:
        # TODO(synk): cross-attention path is correct but less fused (3 projections
        # + an XLA concat); not exercised by beliefppg's self-attention usage.
        q = _tiled_linear(query.reshape(B * Lq, E).astype(cd),
                          params["wq"].astype(cd), params["bq"],
                          out_dtype=cd, compute_dtype=cd).reshape(B, Lq, E)
        k = _tiled_linear(key.reshape(B * Lk, E).astype(cd),
                          params["wk"].astype(cd), params["bk"],
                          out_dtype=cd, compute_dtype=cd).reshape(B, Lk, E)
        v = _tiled_linear(value.reshape(B * Lk, E).astype(cd),
                          params["wv"].astype(cd), params["bv"],
                          out_dtype=cd, compute_dtype=cd).reshape(B, Lk, E)
        qkv = jnp.concatenate([q, k, v], axis=-1)

    # Attention + fused output projection; no wrapper-level head split/merge
    # transposes and no HBM round-trip of the merged attention result.
    out = _attention_core(qkv, params["wo"].astype(cd), params["bo"],
                          num_heads=H, scaling=scaling, compute_dtype=cd)
    # TODO(synk): need_weights / key_padding_mask / attn_mask paths not exercised
    # (module defaults); dropout is identity at drop_prob=0.0 (eval).
    return out


# ---------------------------------------------------------------------------
# Deterministic parameter init (mirrors _reset_parameters shapes)
# ---------------------------------------------------------------------------

def _xavier_uniform(key, shape, gain=1.0):
    fan_out, fan_in = shape
    bound = gain * np.sqrt(6.0 / (fan_in + fan_out))
    return jax.random.uniform(key, shape, jnp.float32, -bound, bound)


def init_params(key, embed_dim):
    kq, kk, kv, ko = jax.random.split(key, 4)
    g = 1.0 / np.sqrt(2.0)
    return {
        "wq": _xavier_uniform(kq, (embed_dim, embed_dim), gain=g),
        "wk": _xavier_uniform(kk, (embed_dim, embed_dim), gain=g),
        "wv": _xavier_uniform(kv, (embed_dim, embed_dim), gain=g),
        "wo": _xavier_uniform(ko, (embed_dim, embed_dim), gain=1.0),
        "bq": jnp.zeros((embed_dim,), jnp.float32),
        "bk": jnp.zeros((embed_dim,), jnp.float32),
        "bv": jnp.zeros((embed_dim,), jnp.float32),
        "bo": jnp.zeros((embed_dim,), jnp.float32),
    }


# ---------------------------------------------------------------------------
# Pure-JAX reference for correctness check
# ---------------------------------------------------------------------------

def reference_mha(query, key, value, params, num_heads):
    B, Lq, E = query.shape
    Lk = key.shape[1]
    H = num_heads
    D = E // H
    scaling = float(D) ** (-0.5)
    q = query @ params["wq"].T + params["bq"]
    k = key @ params["wk"].T + params["bk"]
    v = value @ params["wv"].T + params["bv"]
    q = q * scaling
    qh = q.reshape(B, Lq, H, D).transpose(0, 2, 1, 3)
    kh = k.reshape(B, Lk, H, D).transpose(0, 2, 1, 3)
    vh = v.reshape(B, Lk, H, D).transpose(0, 2, 1, 3)
    s = jnp.einsum("bhqd,bhkd->bhqk", qh, kh)
    p = jax.nn.softmax(s, axis=-1)
    a = jnp.einsum("bhqk,bhkd->bhqd", p, vh)
    a = a.transpose(0, 2, 1, 3).reshape(B, Lq, E)
    return a @ params["wo"].T + params["bo"]


# ---------------------------------------------------------------------------

if __name__ == "__main__":
    B, L, E, H = 2, 8, 32, 4  # batch, seq, embed_dim, num_heads (head_dim = 8)

    root = jax.random.PRNGKey(0)
    kp, kx = jax.random.split(root)
    params = init_params(kp, E)
    x = jax.random.normal(kx, (B, L, E), jnp.float32)

    ref = reference_mha(x, x, x, params, num_heads=H)

    # f32 path: strict correctness check.
    out_f32 = multihead_attention_pallas(x, x, x, params, num_heads=H,
                                         compute_dtype=jnp.float32)
    out_f32 = jax.block_until_ready(out_f32)
    np.testing.assert_allclose(np.asarray(out_f32), np.asarray(ref),
                               rtol=1e-4, atol=1e-4)

    # bf16 matmul path (f32 accumulation / f32 softmax): loose tolerance.
    out_bf16 = multihead_attention_pallas(x, x, x, params, num_heads=H,
                                          compute_dtype=jnp.bfloat16)
    out_bf16 = jax.block_until_ready(out_bf16)
    np.testing.assert_allclose(np.asarray(out_bf16), np.asarray(ref),
                               rtol=3e-2, atol=3e-2)

    print("KERNEL_OK")
</pallas_src>

<mosaic_0001>
module attributes {stable_mosaic.version = 11 : i64} {
  func.func @_linear_kernel(%arg0: i32, %arg1: memref<16x32xf32, #tpu.memory_space<vmem>>, %arg2: memref<96x32xf32, #tpu.memory_space<vmem>>, %arg3: memref<1x96xf32, #tpu.memory_space<vmem>>, %arg4: memref<16x96xf32, #tpu.memory_space<vmem>>) attributes {dimension_semantics = [#tpu.dimension_semantics<parallel>], iteration_bounds = array<i64: 1>, scalar_prefetch = 0 : i64, scratch_operands = 0 : i64, tpu.core_type = #tpu.core_type<tc>, window_params = [{transform_indices = @transform_0, window_bounds = array<i64: 16, 32>}, {pipeline_mode = #tpu.pipeline_mode<synchronous>, transform_indices = @transform_1, window_bounds = array<i64: 96, 32>}, {pipeline_mode = #tpu.pipeline_mode<synchronous>, transform_indices = @transform_2, window_bounds = array<i64: 1, 96>}, {transform_indices = @transform_3, window_bounds = array<i64: 16, 96>}]} {
    %c0 = arith.constant 0 : index
    %c0_0 = arith.constant 0 : index
    %0 = vector.load %arg1[%c0, %c0_0] : memref<16x32xf32, #tpu.memory_space<vmem>>, vector<16x32xf32>
    %c0_1 = arith.constant 0 : index
    %c0_2 = arith.constant 0 : index
    %1 = vector.load %arg2[%c0_1, %c0_2] : memref<96x32xf32, #tpu.memory_space<vmem>>, vector<96x32xf32>
    %cst = arith.constant dense<0.000000e+00> : vector<16x96xf32>
    %2 = tpu.matmul %0, %1, %cst {dimension_numbers = #tpu.dot_dimension_numbers<[1], [1], [0], [0], [0, 0, 1, 0], [], []>} : vector<16x32xf32>, vector<96x32xf32>, vector<16x96xf32> -> vector<16x96xf32>
    %c0_3 = arith.constant 0 : index
    %c0_4 = arith.constant 0 : index
    %3 = vector.load %arg3[%c0_3, %c0_4] : memref<1x96xf32, #tpu.memory_space<vmem>>, vector<1x96xf32>
    %4 = vector.broadcast %3 : vector<1x96xf32> to vector<16x96xf32>
    %5 = arith.addf %2, %4 : vector<16x96xf32>
    %c0_5 = arith.constant 0 : index
    %c0_6 = arith.constant 0 : index
    %6 = vector.load %arg4[%c0_5, %c0_6] : memref<16x96xf32, #tpu.memory_space<vmem>>, vector<16x96xf32>
    tpu.vector_store %arg4[%c0_5, %c0_6], %5 {strides = array<i32>} : memref<16x96xf32, #tpu.memory_space<vmem>>, vector<16x96xf32>,
    return
  }
  func.func @transform_0(%arg0: i32) -> (i32, i32) {
    %c0_i32 = arith.constant 0 : i32
    %c0_i32_0 = arith.constant 0 : i32
    return %arg0, %c0_i32 : i32, i32
  }
  func.func @transform_1(%arg0: i32) -> (i32, i32) {
    %c0_i32 = arith.constant 0 : i32
    %c0_i32_0 = arith.constant 0 : i32
    %c0_i32_1 = arith.constant 0 : i32
    return %c0_i32, %c0_i32_0 : i32, i32
  }
  func.func @transform_2(%arg0: i32) -> (i32, i32) {
    %c0_i32 = arith.constant 0 : i32
    %c0_i32_0 = arith.constant 0 : i32
    %c0_i32_1 = arith.constant 0 : i32
    return %c0_i32, %c0_i32_0 : i32, i32
  }
  func.func @transform_3(%arg0: i32) -> (i32, i32) {
    %c0_i32 = arith.constant 0 : i32
    %c0_i32_0 = arith.constant 0 : i32
    return %arg0, %c0_i32 : i32, i32
  }
}

</mosaic_0001>

<bundles_post_ra>
// kernel: tpu_custom_call.1
= control target key start
LH: loop header
LB: loop body
LE: loop exit
PB: predicated region body
PF: predicated region fallthrough
CT: control target
= control target key end

     0   :  { %vm36_vm0 = vcmask 261120   ;;  %s351_s0 = inlined_call_operand.vmem [shape: f32[16,32], index: 0, kind: input, shape index: {}]   ;;  %s352_s1 = inlined_call_operand.vmem [shape: f32[96,32], index: 1, kind: input, shape index: {}]   ;;  %s353_s2 = inlined_call_operand.vmem [shape: f32[1,96], index: 2, kind: input, shape index: {}]   ;;  %s354_s3 = inlined_call_operand.hbm [shape: f32[16,96], index: 3, kind: output, shape index: {}]  }
   0x1   :  { %v28_v0 = vld [vmem:[%s352_s1 + $0x58] sm:$0xff]  ;;  %v27_v1 = vld [vmem:[%s352_s1 + $0x50] sm:$0xff]  ;;  %v26_v2 = vld [vmem:[%s352_s1 + $0x48] sm:$0xff] }
   0x2   :  { %202 = vmatprep.subr.msk.mxu0 %vm36_vm0, %v28_v0  ;;  %v15_v3 = vld [vmem:[%s351_s0] sm:$0xff] }
   0x3   :  { %203 = vmatpush3.xpose.msk.msra.mxu0 %vm36_vm0, %v28_v0 }
   0x4   :  { %204 = vmatprep.subr.msk.mxu0 %vm36_vm0, %v27_v1 }
   0x5   :  { %8 = vsyncpa [#allocation3], 0  ;;  %226 = vmatprep.mubr.msk.f32.mxu0 %vm36_vm0, %v15_v3  ;;  %v25_v4 = vld [vmem:[%s352_s1 + $0x40] sm:$0xff]  ;;  %v24_v5 = vld [vmem:[%s352_s1 + $0x38] sm:$0xff]  ;;  %s254_s15 = smov [#allocation2]   ;;  %vm154_vm1 = vcmask 785408  }
   0x6   :  { %v23_v6 = vld [vmem:[%s352_s1 + $0x30] sm:$0xff]  ;;  %v22_v7 = vld [vmem:[%s352_s1 + $0x28] sm:$0xff]  ;;  %v21_v8 = vld [vmem:[%s352_s1 + $0x20] sm:$0xff]  ;;  %s162_s16 = sshll.u32 %s254_s15, 4  ;;  %s163_s16 = int_to_ptr.vmem [resolvable:$true] %s162_s16 }
   0x7   :  { %205 = vmatpush3.xpose.msk.msra.mxu0 %vm36_vm0, %v27_v1  ;;  %v20_v9 = vld [vmem:[%s352_s1 + $0x18] sm:$0xff]  ;;  %v19_v10 = vld [vmem:[%s352_s1 + $0x10] sm:$0xff]  ;;  %v18_v11 = vld [vmem:[%s352_s1 + $0x8] sm:$0xff]  ;;  %p237_p1 = scmp.lt.s32.totalorder %s163_s16, %s163_s16 }
   0x8   :  { %206 = vmatprep.subr.msk.mxu0 %vm36_vm0, %v26_v2  ;;  %v17_v12 = vld [vmem:[%s352_s1] sm:$0xff]  ;;  %v16_v13 = vld [vmem:[%s351_s0 + $0x8] sm:$0xff]  ;;  %s232_s1 = scalar_lea.vmem %s163_s16, 256 }
   0x9   :  { %v173_v14 = vld [vmem:[%s353_s2] ss:$0 sm:$0xff]  ;;  %p233_p0 = scmp.ne.s32.totalorder %s163_s16, %s232_s1  ;;  %p238_p2 = scmp.lt.s32.totalorder %s232_s1, %s232_s1 }
   0xb   :  { %207 = vmatpush3.xpose.msk.msra.mxu0 %vm36_vm0, %v26_v2  ;;  %p239_p3 = por %p238_p2, %p237_p1 }
   0xc   :  { %208 = vmatprep.subr.msk.mxu0 %vm36_vm0, %v25_v4 }
   0xd   :  { %p240_p4 = pnand %p239_p3, %p233_p0 }
   0xf   :  { %209 = vmatpush3.xpose.msk.msra.mxu0 %vm36_vm0, %v25_v4 }
  0x10   :  { %210 = vmatprep.subr.msk.mxu0 %vm36_vm0, %v24_v5 }
  0x13   :  { %211 = vmatpush3.xpose.msk.msra.mxu0 %vm36_vm0, %v24_v5 }
  0x14   :  { %212 = vmatprep.subr.msk.mxu0 %vm36_vm0, %v23_v6 }
  0x17   :  { %213 = vmatpush3.xpose.msk.msra.mxu0 %vm36_vm0, %v23_v6 }
  0x18   :  { %214 = vmatprep.subr.msk.mxu0 %vm36_vm0, %v22_v7 }
  0x1b   :  { %215 = vmatpush3.xpose.msk.msra.mxu0 %vm36_vm0, %v22_v7 }
  0x1c   :  { %216 = vmatprep.subr.msk.mxu0 %vm36_vm0, %v21_v8 }
  0x1f   :  { %217 = vmatpush3.xpose.msk.msra.mxu0 %vm36_vm0, %v21_v8 }
  0x20   :  { %218 = vmatprep.subr.msk.mxu0 %vm36_vm0, %v20_v9 }
  0x23   :  { %219 = vmatpush3.xpose.msk.msra.mxu0 %vm36_vm0, %v20_v9 }
  0x24   :  { %220 = vmatprep.subr.msk.mxu0 %vm36_vm0, %v19_v10 }
  0x27   :  { %221 = vmatpush3.xpose.msk.msra.mxu0 %vm36_vm0, %v19_v10 }
  0x28   :  { %222 = vmatprep.subr.msk.mxu0 %vm36_vm0, %v18_v11 }
  0x2b   :  { %223 = vmatpush3.xpose.msk.msra.mxu0 %vm36_vm0, %v18_v11 }
  0x2c   :  { %224 = vmatprep.subr.msk.mxu0 %vm36_vm0, %v17_v12 }
  0x2f   :  { %225 = vmatpush3.xpose.msk.msra.mxu0 %vm36_vm0, %v17_v12 }
  0x32   :  { %227 = vmatmul.mubr.msk.f32.vlgmr.msra.gmra.mxu0 %vm36_vm0, %v16_v13 }
  0xf2   :  { %v228_v15 = vpop.f32.mrf.mxu0 }
  0xf3   :  { %v151_v16 = vadd.f32 %v228_v15, %v173_v14 }
  0xf4   :  { %v145_v17 = vpop.f32.mrf.mxu0 }
  0xf5   :  { %156 = vst.msk [vmem:[#allocation2 + $0x8] sm:$0xff] %vm154_vm1, %v151_v16  ;;  %v146_v18 = vadd.f32 %v173_v14, %v145_v17 }
  0xf7   :  { %155 = vst.msk [vmem:[#allocation2] sm:$0xff] %vm154_vm1, %v146_v18 }
  0xf8   :  { %243 = shalt.err (!%p240_p4)
}
  0xf9   :  { %s255_s0 = smov 128   ;;  %s256_s17 = smov 8  }
  0xfa   :  { %168 = dma.vmem_to_hbm [thread:$0]  %s163_s16, 256, %s354_s3, [#allocation3], %s255_s0, %s255_s0, %s256_s17  }
  0xfb   :  { %252 = dma.done.wait [#allocation3], 256  }
  0xfc   :  { %253 = vsyncadd [#allocation3], 4294967040 }
  0xfd   :  { %172 = vsyncpa [#allocation3], 1 }

</bundles_post_ra>
